<compile_context>
chip_gen: v6e
topology: v6e:2x2x1
jax: 0.10.0
libtpu: 0.0.40
codegen_flags: <defaults>
</compile_context>

<pallas_src>
import jax
import jax.numpy as jnp
from jax.experimental import pallas as pl
from jax.experimental.pallas import tpu as pltpu


def _round_up(a, b):
    return ((a + b - 1) // b) * b


def _nbytes(a):
    return a.size * jnp.dtype(a.dtype).itemsize


def ffn_kernel(x_ref, w1_ref, b1_ref, w2_ref, b2_ref, g_ref, beta_ref,
               o_ref, acc_ref):
    j = pl.program_id(1)

    @pl.when(j == 0)
    def _init():
        acc_ref[...] = jnp.zeros_like(acc_ref)

    # fc1 chunk + ReLU.  Matmul operands stay in their native (possibly bf16)
    # dtype; accumulation is f32.  dropout1 == identity in eval mode.
    x = x_ref[...]                                                 # [tm, d_model]
    h = jnp.dot(x, w1_ref[...], preferred_element_type=jnp.float32)
    h = jnp.maximum(h + b1_ref[...].astype(jnp.float32), 0.0)       # [tm, tf]

    # fc2 chunk, accumulated over the d_ff reduction axis.
    acc_ref[...] += jnp.dot(h.astype(w2_ref.dtype), w2_ref[...],
                            preferred_element_type=jnp.float32)

    @pl.when(j == pl.num_programs(1) - 1)
    def _finalize():
        # residual + LayerNorm(eps=1e-6) epilogue in f32.
        # dropout2 == identity in eval mode.
        y = acc_ref[...] + b2_ref[...].astype(jnp.float32)
        z = x.astype(jnp.float32) + y                              # [tm, d_model]
        inv_d = 1.0 / z.shape[-1]
        # single-pass stats: mean = E[z], var = E[z^2] - mean^2
        s1 = jnp.sum(z, axis=-1, keepdims=True)
        s2 = jnp.sum(z * z, axis=-1, keepdims=True)
        mean = s1 * inv_d
        var = s2 * inv_d - mean * mean
        zn = (z - mean) * jax.lax.rsqrt(var + 1e-6)
        out = zn * g_ref[...].astype(jnp.float32) + beta_ref[...].astype(jnp.float32)
        o_ref[...] = out.astype(o_ref.dtype)


def positionwise_ffn(x, w1, b1, w2, b2, gamma, beta, *,
                     row_tile=256, ff_tile=512, vmem_limit_bytes=None):
    """x: [B, S, d_model]; w1: [d_model, d_ff]; w2: [d_ff, d_model]."""
    B, S, d_model = x.shape
    d_ff = w1.shape[1]
    N = B * S
    x2d = x.reshape(N, d_model)

    # Row tile: big enough to fill the MXU, clamped / 8-aligned for tiny inputs.
    row_tile = min(_round_up(row_tile, 8), _round_up(N, 8))
    # d_ff tile: must evenly divide d_ff and (unless it covers all of d_ff) be
    # a multiple of 128; otherwise fall back to the un-tiled reduction.
    ff_tile = min(ff_tile, d_ff)
    if d_ff % ff_tile != 0 or (ff_tile != d_ff and ff_tile % 128 != 0):
        ff_tile = d_ff

    grid = (pl.cdiv(N, row_tile), d_ff // ff_tile)

    # (1, dim) views of the vectors so they broadcast cleanly inside the kernel.
    b1_2d = b1.reshape(1, d_ff)
    b2_2d = b2.reshape(1, d_model)
    g_2d = gamma.reshape(1, d_model)
    beta_2d = beta.reshape(1, d_model)

    cost = pl.CostEstimate(
        flops=4 * N * d_model * d_ff,                  # two matmuls
        transcendentals=N,                             # one rsqrt per row
        bytes_accessed=(_nbytes(x2d) + _nbytes(w1) + _nbytes(w2)
                        + _nbytes(b1) + _nbytes(b2) + _nbytes(gamma)
                        + _nbytes(beta)
                        + N * d_model * jnp.dtype(x.dtype).itemsize),
    )

    out2d = pl.pallas_call(
        ffn_kernel,
        out_shape=jax.ShapeDtypeStruct((N, d_model), x.dtype),
        grid_spec=pltpu.PrefetchScalarGridSpec(
            num_scalar_prefetch=0,
            grid=grid,
            in_specs=[
                pl.BlockSpec((row_tile, d_model), lambda i, j: (i, 0)),  # x tile
                pl.BlockSpec((d_model, ff_tile), lambda i, j: (0, j)),   # W1 slice
                pl.BlockSpec((1, ff_tile), lambda i, j: (0, j)),         # b1 slice
                pl.BlockSpec((ff_tile, d_model), lambda i, j: (j, 0)),   # W2 slice
                pl.BlockSpec((1, d_model), lambda i, j: (0, 0)),         # b2
                pl.BlockSpec((1, d_model), lambda i, j: (0, 0)),         # LN gamma
                pl.BlockSpec((1, d_model), lambda i, j: (0, 0)),         # LN beta
            ],
            out_specs=pl.BlockSpec((row_tile, d_model), lambda i, j: (i, 0)),
            scratch_shapes=[pltpu.VMEM((row_tile, d_model), jnp.float32)],
        ),
        compiler_params=pltpu.CompilerParams(
            dimension_semantics=("parallel", "arbitrary"),
            vmem_limit_bytes=vmem_limit_bytes,
        ),
        cost_estimate=cost,
    )(x2d, w1, b1_2d, w2, b2_2d, g_2d, beta_2d)

    return out2d.reshape(B, S, d_model)


def _reference(x, w1, b1, w2, b2, gamma, beta):
    h = jnp.maximum(x @ w1 + b1, 0.0)
    y = h @ w2 + b2
    z = x + y
    mean = jnp.mean(z, axis=-1, keepdims=True)
    var = jnp.mean((z - mean) ** 2, axis=-1, keepdims=True)
    zn = (z - mean) / jnp.sqrt(var + 1e-6)
    return zn * gamma + beta


def _run_case(batch, seq, d_model, d_ff, row_tile, ff_tile):
    key = jax.random.PRNGKey(0)
    kx, kw1, kb1, kw2, kb2 = jax.random.split(key, 5)

    x = jax.random.normal(kx, (batch, seq, d_model), dtype=jnp.float32)

    # PyTorch Linear default init: U(-1/sqrt(fan_in), 1/sqrt(fan_in)),
    # weights stored as [in, out] (transposed vs. nn.Linear's [out, in]).
    lim1 = 1.0 / (d_model ** 0.5)
    lim2 = 1.0 / (d_ff ** 0.5)
    w1 = jax.random.uniform(kw1, (d_model, d_ff), minval=-lim1, maxval=lim1,
                            dtype=jnp.float32)
    b1 = jax.random.uniform(kb1, (d_ff,), minval=-lim1, maxval=lim1,
                            dtype=jnp.float32)
    w2 = jax.random.uniform(kw2, (d_ff, d_model), minval=-lim2, maxval=lim2,
                            dtype=jnp.float32)
    b2 = jax.random.uniform(kb2, (d_model,), minval=-lim2, maxval=lim2,
                            dtype=jnp.float32)
    gamma = jnp.ones((d_model,), dtype=jnp.float32)   # LayerNorm weight init
    beta = jnp.zeros((d_model,), dtype=jnp.float32)   # LayerNorm bias init

    out = positionwise_ffn(x, w1, b1, w2, b2, gamma, beta,
                           row_tile=row_tile, ff_tile=ff_tile)
    out = jax.block_until_ready(out)

    ref = _reference(x, w1, b1, w2, b2, gamma, beta)
    assert out.shape == (batch, seq, d_model)
    assert jnp.allclose(out, ref, atol=1e-4, rtol=1e-4), \
        f"mismatch vs JAX reference (case {batch}x{seq}x{d_model}/{d_ff})"


if __name__ == "__main__":
    # Case 1: small module-consistent shapes (single grid step).
    _run_case(batch=2, seq=8, d_model=32, d_ff=64, row_tile=256, ff_tile=512)
    # Case 2: exercises multiple row tiles (with a partial last tile) and the
    # d_ff reduction axis (lane-dense d_model=128).
    _run_case(batch=2, seq=20, d_model=128, d_ff=256, row_tile=16, ff_tile=128)

    print("KERNEL_OK")
</pallas_src>

<mosaic_0001>
module attributes {stable_mosaic.version = 11 : i64} {
  func.func @ffn_kernel(%arg0: i32, %arg1: i32, %arg2: memref<16x32xf32, #tpu.memory_space<vmem>>, %arg3: memref<32x64xf32, #tpu.memory_space<vmem>>, %arg4: memref<1x64xf32, #tpu.memory_space<vmem>>, %arg5: memref<64x32xf32, #tpu.memory_space<vmem>>, %arg6: memref<1x32xf32, #tpu.memory_space<vmem>>, %arg7: memref<1x32xf32, #tpu.memory_space<vmem>>, %arg8: memref<1x32xf32, #tpu.memory_space<vmem>>, %arg9: memref<16x32xf32, #tpu.memory_space<vmem>>, %arg10: memref<16x32xf32, #tpu.memory_space<vmem>>) attributes {dimension_semantics = [#tpu.dimension_semantics<parallel>, #tpu.dimension_semantics<arbitrary>], iteration_bounds = array<i64: 1, 1>, scalar_prefetch = 0 : i64, scratch_operands = 1 : i64, tpu.core_type = #tpu.core_type<tc>, window_params = [{transform_indices = @transform_0, window_bounds = array<i64: 16, 32>}, {transform_indices = @transform_1, window_bounds = array<i64: 32, 64>}, {transform_indices = @transform_2, window_bounds = array<i64: 1, 64>}, {transform_indices = @transform_3, window_bounds = array<i64: 64, 32>}, {pipeline_mode = #tpu.pipeline_mode<synchronous>, transform_indices = @transform_4, window_bounds = array<i64: 1, 32>}, {pipeline_mode = #tpu.pipeline_mode<synchronous>, transform_indices = @transform_5, window_bounds = array<i64: 1, 32>}, {pipeline_mode = #tpu.pipeline_mode<synchronous>, transform_indices = @transform_6, window_bounds = array<i64: 1, 32>}, {transform_indices = @transform_7, window_bounds = array<i64: 16, 32>}]} {
    %c0_i32 = arith.constant 0 : i32
    %0 = arith.cmpi eq, %arg1, %c0_i32 : i32
    %1 = arith.extui %0 : i1 to i32
    %c0_i32_0 = arith.constant 0 : i32
    %2 = arith.cmpi ne, %1, %c0_i32_0 : i32
    scf.if %2 {
      %cst_16 = arith.constant 0.000000e+00 : f32
      %19 = vector.broadcast %cst_16 : f32 to vector<16x32xf32>
      %c0_17 = arith.constant 0 : index
      %c0_18 = arith.constant 0 : index
      %20 = vector.load %arg10[%c0_17, %c0_18] : memref<16x32xf32, #tpu.memory_space<vmem>>, vector<16x32xf32>
      tpu.vector_store %arg10[%c0_17, %c0_18], %19 {strides = array<i32>} : memref<16x32xf32, #tpu.memory_space<vmem>>, vector<16x32xf32>,
    } else {
    }
    %c0 = arith.constant 0 : index
    %c0_1 = arith.constant 0 : index
    %3 = vector.load %arg2[%c0, %c0_1] : memref<16x32xf32, #tpu.memory_space<vmem>>, vector<16x32xf32>
    %c0_2 = arith.constant 0 : index
    %c0_3 = arith.constant 0 : index
    %4 = vector.load %arg3[%c0_2, %c0_3] : memref<32x64xf32, #tpu.memory_space<vmem>>, vector<32x64xf32>
    %cst = arith.constant dense<0.000000e+00> : vector<16x64xf32>
    %5 = tpu.matmul %3, %4, %cst {dimension_numbers = #tpu.dot_dimension_numbers<[1], [0], [0], [1], [0, 0, 1, 1], [], []>} : vector<16x32xf32>, vector<32x64xf32>, vector<16x64xf32> -> vector<16x64xf32>
    %c0_4 = arith.constant 0 : index
    %c0_5 = arith.constant 0 : index
    %6 = vector.load %arg4[%c0_4, %c0_5] : memref<1x64xf32, #tpu.memory_space<vmem>>, vector<1x64xf32>
    %7 = vector.broadcast %6 : vector<1x64xf32> to vector<16x64xf32>
    %8 = arith.addf %5, %7 : vector<16x64xf32>
    %cst_6 = arith.constant 0.000000e+00 : f32
    %9 = vector.broadcast %cst_6 : f32 to vector<16x64xf32>
    %10 = arith.maximumf %8, %9 : vector<16x64xf32>
    %c0_7 = arith.constant 0 : index
    %c0_8 = arith.constant 0 : index
    %11 = vector.load %arg10[%c0_7, %c0_8] : memref<16x32xf32, #tpu.memory_space<vmem>>, vector<16x32xf32>
    %c0_9 = arith.constant 0 : index
    %c0_10 = arith.constant 0 : index
    %12 = vector.load %arg5[%c0_9, %c0_10] : memref<64x32xf32, #tpu.memory_space<vmem>>, vector<64x32xf32>
    %cst_11 = arith.constant dense<0.000000e+00> : vector<16x32xf32>
    %13 = tpu.matmul %10, %12, %cst_11 {dimension_numbers = #tpu.dot_dimension_numbers<[1], [0], [0], [1], [0, 0, 1, 1], [], []>} : vector<16x64xf32>, vector<64x32xf32>, vector<16x32xf32> -> vector<16x32xf32>
    %14 = arith.addf %11, %13 : vector<16x32xf32>
    %c0_12 = arith.constant 0 : index
    %c0_13 = arith.constant 0 : index
    %15 = vector.load %arg10[%c0_12, %c0_13] : memref<16x32xf32, #tpu.memory_space<vmem>>, vector<16x32xf32>
    tpu.vector_store %arg10[%c0_12, %c0_13], %14 {strides = array<i32>} : memref<16x32xf32, #tpu.memory_space<vmem>>, vector<16x32xf32>,
    %c0_i32_14 = arith.constant 0 : i32
    %16 = arith.cmpi eq, %arg1, %c0_i32_14 : i32
    %17 = arith.extui %16 : i1 to i32
    %c0_i32_15 = arith.constant 0 : i32
    %18 = arith.cmpi ne, %17, %c0_i32_15 : i32
    scf.if %18 {
      %c0_16 = arith.constant 0 : index
      %c0_17 = arith.constant 0 : index
      %19 = vector.load %arg10[%c0_16, %c0_17] : memref<16x32xf32, #tpu.memory_space<vmem>>, vector<16x32xf32>
      %c0_18 = arith.constant 0 : index
      %c0_19 = arith.constant 0 : index
      %20 = vector.load %arg6[%c0_18, %c0_19] : memref<1x32xf32, #tpu.memory_space<vmem>>, vector<1x32xf32>
      %21 = vector.broadcast %20 : vector<1x32xf32> to vector<16x32xf32>
      %22 = arith.addf %19, %21 : vector<16x32xf32>
      %23 = arith.addf %3, %22 : vector<16x32xf32>
      %cst_20 = arith.constant dense<0.000000e+00> : vector<16xf32>
      %24 = vector.multi_reduction <add>, %23, %cst_20 [1] : vector<16x32xf32> to vector<16xf32>
      %25 = vector.shape_cast %24 : vector<16xf32> to vector<16x1xf32>
      %26 = arith.mulf %23, %23 : vector<16x32xf32>
      %cst_21 = arith.constant dense<0.000000e+00> : vector<16xf32>
      %27 = vector.multi_reduction <add>, %26, %cst_21 [1] : vector<16x32xf32> to vector<16xf32>
      %28 = vector.shape_cast %27 : vector<16xf32> to vector<16x1xf32>
      %cst_22 = arith.constant 3.125000e-02 : f32
      %29 = vector.broadcast %cst_22 : f32 to vector<16x1xf32>
      %30 = arith.mulf %25, %29 : vector<16x1xf32>
      %cst_23 = arith.constant 3.125000e-02 : f32
      %31 = vector.broadcast %cst_23 : f32 to vector<16x1xf32>
      %32 = arith.mulf %28, %31 : vector<16x1xf32>
      %33 = arith.mulf %30, %30 : vector<16x1xf32>
      %34 = arith.subf %32, %33 : vector<16x1xf32>
      %35 = vector.broadcast %30 : vector<16x1xf32> to vector<16x32xf32>
      %36 = arith.subf %23, %35 : vector<16x32xf32>
      %cst_24 = arith.constant 9.99999997E-7 : f32
      %37 = vector.broadcast %cst_24 : f32 to vector<16x1xf32>
      %38 = arith.addf %34, %37 : vector<16x1xf32>
      %39 = math.rsqrt %38 : vector<16x1xf32>
      %40 = vector.broadcast %39 : vector<16x1xf32> to vector<16x32xf32>
      %41 = arith.mulf %36, %40 : vector<16x32xf32>
      %c0_25 = arith.constant 0 : index
      %c0_26 = arith.constant 0 : index
      %42 = vector.load %arg7[%c0_25, %c0_26] : memref<1x32xf32, #tpu.memory_space<vmem>>, vector<1x32xf32>
      %43 = vector.broadcast %42 : vector<1x32xf32> to vector<16x32xf32>
      %44 = arith.mulf %41, %43 : vector<16x32xf32>
      %c0_27 = arith.constant 0 : index
      %c0_28 = arith.constant 0 : index
      %45 = vector.load %arg8[%c0_27, %c0_28] : memref<1x32xf32, #tpu.memory_space<vmem>>, vector<1x32xf32>
      %46 = vector.broadcast %45 : vector<1x32xf32> to vector<16x32xf32>
      %47 = arith.addf %44, %46 : vector<16x32xf32>
      %c0_29 = arith.constant 0 : index
      %c0_30 = arith.constant 0 : index
      %48 = vector.load %arg9[%c0_29, %c0_30] : memref<16x32xf32, #tpu.memory_space<vmem>>, vector<16x32xf32>
      tpu.vector_store %arg9[%c0_29, %c0_30], %47 {strides = array<i32>} : memref<16x32xf32, #tpu.memory_space<vmem>>, vector<16x32xf32>,
    } else {
    }
    return
  }
  func.func @transform_0(%arg0: i32, %arg1: i32) -> (i32, i32) {
    %c0_i32 = arith.constant 0 : i32
    %c0_i32_0 = arith.constant 0 : i32
    return %arg0, %c0_i32 : i32, i32
  }
  func.func @transform_1(%arg0: i32, %arg1: i32) -> (i32, i32) {
    %c0_i32 = arith.constant 0 : i32
    %c0_i32_0 = arith.constant 0 : i32
    return %c0_i32, %arg1 : i32, i32
  }
  func.func @transform_2(%arg0: i32, %arg1: i32) -> (i32, i32) {
    %c0_i32 = arith.constant 0 : i32
    %c0_i32_0 = arith.constant 0 : i32
    return %c0_i32, %arg1 : i32, i32
  }
  func.func @transform_3(%arg0: i32, %arg1: i32) -> (i32, i32) {
    %c0_i32 = arith.constant 0 : i32
    %c0_i32_0 = arith.constant 0 : i32
    return %arg1, %c0_i32 : i32, i32
  }
  func.func @transform_4(%arg0: i32, %arg1: i32) -> (i32, i32) {
    %c0_i32 = arith.constant 0 : i32
    %c0_i32_0 = arith.constant 0 : i32
    %c0_i32_1 = arith.constant 0 : i32
    return %c0_i32, %c0_i32_0 : i32, i32
  }
  func.func @transform_5(%arg0: i32, %arg1: i32) -> (i32, i32) {
    %c0_i32 = arith.constant 0 : i32
    %c0_i32_0 = arith.constant 0 : i32
    %c0_i32_1 = arith.constant 0 : i32
    return %c0_i32, %c0_i32_0 : i32, i32
  }
  func.func @transform_6(%arg0: i32, %arg1: i32) -> (i32, i32) {
    %c0_i32 = arith.constant 0 : i32
    %c0_i32_0 = arith.constant 0 : i32
    %c0_i32_1 = arith.constant 0 : i32
    return %c0_i32, %c0_i32_0 : i32, i32
  }
  func.func @transform_7(%arg0: i32, %arg1: i32) -> (i32, i32) {
    %c0_i32 = arith.constant 0 : i32
    %c0_i32_0 = arith.constant 0 : i32
    return %arg0, %c0_i32 : i32, i32
  }
}

</mosaic_0001>

<bundles_post_ra>
// kernel: tpu_custom_call.1
= control target key start
LH: loop header
LB: loop body
LE: loop exit
PB: predicated region body
PF: predicated region fallthrough
CT: control target
= control target key end

     0   :  { %vm31_vm0 = vcmask 261120   ;;  %s510_s0 = inlined_call_operand.vmem [shape: f32[16,32], index: 0, kind: input, shape index: {}]   ;;  %s511_s1 = inlined_call_operand.vmem [shape: f32[32,64], index: 1, kind: input, shape index: {}]   ;;  %s512_s2 = inlined_call_operand.vmem [shape: f32[1,64], index: 2, kind: input, shape index: {}]   ;;  %s513_s3 = inlined_call_operand.vmem [shape: f32[64,32], index: 3, kind: input, shape index: {}]   ;;  %s514_s4 = inlined_call_operand.vmem [shape: f32[1,32], index: 4, kind: input, shape index: {}]   ;;  %s515_s5 = inlined_call_operand.vmem [shape: f32[1,32], index: 5, kind: input, shape index: {}]   ;;  %s516_s6 = inlined_call_operand.vmem [shape: f32[1,32], index: 6, kind: input, shape index: {}]   ;;  %s517_s7 = inlined_call_operand.hbm [shape: f32[16,32], index: 7, kind: output, shape index: {}]  }
   0x1   :  { %v39_v0 = vld [vmem:[%s511_s1 + $0x18] sm:$0xff]  ;;  %v38_v1 = vld [vmem:[%s511_s1 + $0x10] sm:$0xff]  ;;  %v446_v2 = vld [vmem:[%s510_s0] sm:$0xff] }
   0x2   :  { %333 = vmatprep.subr.mxu0 %v39_v0  ;;  %v37_v3 = vld [vmem:[%s511_s1 + $0x8] sm:$0xff]  ;;  %341 = vmatprep.mubr.msk.f32.mxu0 %vm31_vm0, %v446_v2  ;;  %v140_v4 = vld [vmem:[%s513_s3 + $0x38] sm:$0xff]  ;;  %v139_v5 = vld [vmem:[%s513_s3 + $0x30] sm:$0xff] }
   0x3   :  { %334 = vmatpush3.msra.mxu0 %v39_v0  ;;  %344 = vmatprep.subr.mxu1 %v140_v4 }
   0x4   :  { %335 = vmatprep.subr.mxu0 %v38_v1 }
   0x5   :  { %12 = vsyncpa [#allocation4], 0  ;;  %336 = vmatpush3.msra.mxu0 %v38_v1  ;;  %v36_v6 = vld [vmem:[%s511_s1] sm:$0xff]  ;;  %345 = vmatpush3.msra.mxu1 %v140_v4  ;;  %v138_v7 = vld [vmem:[%s513_s3 + $0x28] sm:$0xff]  ;;  %v393_v14 = vmov 0.0   ;;  %vm141_vm1 = vcmask 523264  }
   0x6   :  { %337 = vmatprep.subr.mxu0 %v37_v3  ;;  %346 = vmatprep.subr.mxu1 %v139_v5  ;;  %v35_v8 = vld [vmem:[%s510_s0 + $0x8] sm:$0xff]  ;;  %v137_v9 = vld [vmem:[%s513_s3 + $0x20] sm:$0xff]  ;;  %v136_v10 = vld [vmem:[%s513_s3 + $0x18] sm:$0xff]  ;;  %33 = vst.msk [vmem:[#allocation2 + $0x8] sm:$0xff] %vm31_vm0, %v393_v14  ;;  %s394_s9 = smov [#allocation3]  }
   0x7   :  { %338 = vmatpush3.msra.mxu0 %v37_v3  ;;  %347 = vmatpush3.msra.mxu1 %v139_v5  ;;  %v135_v11 = vld [vmem:[%s513_s3 + $0x10] sm:$0xff]  ;;  %v134_v12 = vld [vmem:[%s513_s3 + $0x8] sm:$0xff]  ;;  %v133_v13 = vld [vmem:[%s513_s3] sm:$0xff]  ;;  %32 = vst.msk [vmem:[#allocation2] sm:$0xff] %vm31_vm0, %v393_v14  ;;  %s298_s10 = sshll.u32 %s394_s9, 4  ;;  %s299_s10 = int_to_ptr.vmem [resolvable:$true] %s298_s10 }
   0x8   :  { %339 = vmatprep.subr.mxu0 %v36_v6  ;;  %348 = vmatprep.subr.mxu1 %v138_v7  ;;  %v309_v15 = vld [vmem:[%s512_s2] ss:$0 sm:$0xff]  ;;  %p376_p1 = scmp.lt.s32.totalorder %s299_s10, %s299_s10 }
   0x9   :  { %340 = vmatpush3.msra.mxu0 %v36_v6  ;;  %349 = vmatpush3.msra.mxu1 %v138_v7  ;;  %v314_v28 = vld [vmem:[%s514_s4] ss:$0 sm:$0xff] }
   0xa   :  { %342 = vmatmul.mubr.msk.f32.vlgmr.msra.gmra.mxu0 %vm31_vm0, %v35_v8  ;;  %350 = vmatprep.subr.mxu1 %v137_v9  ;;  %v315_v57 = vld [vmem:[%s515_s5] ss:$0 sm:$0xff]  ;;  %s371_s5 = scalar_lea.vmem %s299_s10, 256 }
   0xb   :  { %351 = vmatpush3.msra.mxu1 %v137_v9  ;;  %v316_v59 = vld [vmem:[%s516_s6] ss:$0 sm:$0xff]  ;;  %p372_p0 = scmp.ne.s32.totalorder %s299_s10, %s371_s5  ;;  %p377_p2 = scmp.lt.s32.totalorder %s371_s5, %s371_s5 }
   0xc   :  { %352 = vmatprep.subr.mxu1 %v136_v10 }
   0xd   :  { %353 = vmatpush3.msra.mxu1 %v136_v10  ;;  %v132_v22 = vld [vmem:[#allocation2 + $0x8] sm:$0xff]  ;;  %p378_p3 = por %p377_p2, %p376_p1 }
   0xe   :  { %354 = vmatprep.subr.mxu1 %v135_v11  ;;  %v131_v24 = vld [vmem:[#allocation2] sm:$0xff] }
   0xf   :  { %355 = vmatpush3.msra.mxu1 %v135_v11  ;;  %p379_p4 = pnand %p378_p3, %p372_p0 }
  0x10   :  { %356 = vmatprep.subr.mxu1 %v134_v12 }
  0x11   :  { %357 = vmatpush3.msra.mxu1 %v134_v12 }
  0x12   :  { %358 = vmatprep.subr.mxu1 %v133_v13 }
  0x13   :  { %359 = vmatpush3.msra.mxu1 %v133_v13 }
  0xca   :  { %v343_v16 = vpop.f32.mrf.mxu0 }
  0xcb   :  { %v126_v17 = vadd.f32 %v343_v16, %v309_v15 }
  0xcc   :  { %v120_v18 = vpop.f32.mrf.mxu0 }
  0xcd   :  { %v121_v19 = vadd.f32 %v309_v15, %v120_v18  ;;  %v130_v21 = vmax.f32 %v126_v17, 0.0 }
  0xcf   :  { %v129_v20 = vmax.f32 %v121_v19, 0.0 }
  0xd1   :  { %360 = vmatprep.mubr.msk.f32.mxu1 %vm141_vm1, %v129_v20 }
  0xd2   :  { %361 = vmatmul.mubr.msk.f32.vlgmr.msra.gmra.mxu1 %vm141_vm1, %v130_v21 }
 0x192   :  { %v362_v23 = vpop.f32.mrf.mxu1 }
 0x193   :  { %v224_v25 = vadd.f32 %v362_v23, %v132_v22 }
 0x194   :  { %v214_v26 = vpop.f32.mrf.mxu1 }
 0x195   :  { %226 = vst.msk [vmem:[#allocation2 + $0x8] sm:$0xff] %vm31_vm0, %v224_v25  ;;  %v223_v27 = vadd.f32 %v214_v26, %v131_v24 }
 0x197   :  { %225 = vst.msk [vmem:[#allocation2] sm:$0xff] %vm31_vm0, %v223_v27 }
 0x19c   :  { %v231_v29 = vld [vmem:[#allocation2 + $0x8] sm:$0xff] }
 0x19d   :  { %v240_v30 = vadd.f32 %v314_v28, %v231_v29 }
 0x19e   :  { %v230_v31 = vld [vmem:[#allocation2] sm:$0xff] }
 0x19f   :  { %v239_v32 = vadd.f32 %v314_v28, %v230_v31  ;;  %v242_v34 = vadd.f32 %v240_v30, %v35_v8 }
 0x1a1   :  { %v241_v33 = vadd.f32 %v239_v32, %v446_v2  ;;  %v250_v38 = vmul.f32 %v242_v34, %v242_v34  ;;  %v246_v39 = vsel %vm31_vm0, %v242_v34, 0.0 }
 0x1a3   :  { %v243_v35 = vsel %vm31_vm0, %v241_v33, 0.0  ;;  %v249_v36 = vmul.f32 %v241_v33, %v241_v33  ;;  %v254_v40 = vsel %vm31_vm0, %v250_v38, 0.0 }
 0x1a4   :  { %244 = vadd.xlane.f32.xlu0 %v243_v35 }
 0x1a5   :  { %v251_v37 = vsel %vm31_vm0, %v249_v36, 0.0 }
 0x1a6   :  { %252 = vadd.xlane.f32.xlu1 %v251_v37 }
 0x1a8   :  { %247 = vadd.xlane.f32.xlu0 %v246_v39 }
 0x1aa   :  { %255 = vadd.xlane.f32.xlu1 %v254_v40 }
 0x22d   :  { %v245_v41 = vpop.xlane.xlu0 %244 }
 0x22e   :  { %v257_v42 = vmul.f32 0.03125, %v245_v41 }
 0x22f   :  { %v253_v43 = vpop.xlane.xlu1 %252 }
 0x230   :  { %v261_v44 = vmul.f32 %v257_v42, %v257_v42  ;;  %v259_v45 = vmul.f32 0.03125, %v253_v43  ;;  %v265_v55 = vsub.f32 %v241_v33, %v257_v42 }
 0x231   :  { %v248_v46 = vpop.xlane.xlu0 %247 }
 0x232   :  { %v263_v47 = vsub.f32 %v259_v45, %v261_v44  ;;  %v258_v48 = vmul.f32 0.03125, %v248_v46 }
 0x233   :  { %v256_v49 = vpop.xlane.xlu1 %255 }
 0x234   :  { %v267_v50 = vadd.f32 1e-06, %v263_v47  ;;  %v262_v51 = vmul.f32 %v258_v48, %v258_v48  ;;  %v260_v52 = vmul.f32 0.03125, %v256_v49  ;;  %v266_v60 = vsub.f32 %v242_v34, %v258_v48 }
 0x236   :  { %367 = vrsqrt.f32 %v267_v50  ;;  %v264_v53 = vsub.f32 %v260_v52, %v262_v51 }
 0x238   :  { %v268_v54 = vadd.f32 1e-06, %v264_v53 }
 0x23a   :  { %369 = vrsqrt.f32 %v268_v54 }
 0x243   :  { %v368_v56 = vpop.eup %367 }
 0x244   :  { %v271_v58 = vmul.f32 %v368_v56, %v265_v55 }
 0x246   :  { %v280_v61 = vmul.f32 %v315_v57, %v271_v58 }
 0x247   :  { %v370_v62 = vpop.eup %369 }
 0x248   :  { %v272_v63 = vmul.f32 %v370_v62, %v266_v60  ;;  %v289_v0 = vadd.f32 %v316_v59, %v280_v61 }
 0x24a   :  { %v281_v1 = vmul.f32 %v315_v57, %v272_v63  ;;  %291 = vst.msk [vmem:[#allocation3] sm:$0xff] %vm31_vm0, %v289_v0 }
 0x24c   :  { %v290_v2 = vadd.f32 %v316_v59, %v281_v1 }
 0x24e   :  { %292 = vst.msk [vmem:[#allocation3 + $0x8] sm:$0xff] %vm31_vm0, %v290_v2 }
 0x24f   :  { %382 = shalt.err (!%p379_p4)
}
 0x250   :  { %s395_s6 = smov 128   ;;  %s396_s11 = smov 8  }
 0x251   :  { %304 = dma.vmem_to_hbm [thread:$0]  %s299_s10, 256, %s517_s7, [#allocation4], %s395_s6, %s395_s6, %s396_s11  }
 0x252   :  { %391 = dma.done.wait [#allocation4], 256  }
 0x253   :  { %392 = vsyncadd [#allocation4], 4294967040 }
 0x254   :  { %308 = vsyncpa [#allocation4], 1 }

</bundles_post_ra>
